<compile_context>
chip_gen: v5e
topology: v5e:2x2
jax: 0.10.0
libtpu: 0.0.40
codegen_flags: <defaults>
</compile_context>

<pallas_src>
import jax
import jax.numpy as jnp
from jax.experimental import pallas as pl
from jax.experimental.pallas import tpu as pltpu

H_PAD = 16     # hidden padded to a sublane multiple (covers H=10)
N_MAX = 1024   # single-block limit for the batch (lane) axis


def mlp_kernel(x_ref, p_ref, b2_ref, o_ref):
    # x_ref : (1, N)      batch along lanes (full-array VMEM block)
    # p_ref : (H_PAD, 3)  columns = [w1, b1, w2]; padded rows are exactly
    #                     zero, so relu(0*x + 0) = 0 and w2_pad = 0 -> they
    #                     contribute nothing to the sublane reduce.
    # b2_ref: (1, 1)      SMEM scalar, splat on the scalar/VPU path.
    # o_ref : (1, N)      lane output.
    x = x_ref[...]                          # (1, N)
    w1 = p_ref[:, 0:1]                      # (H_PAD, 1)
    b1 = p_ref[:, 1:2]                      # (H_PAD, 1)
    w2 = p_ref[:, 2:3]                      # (H_PAD, 1)

    # Layer 1: hidden = relu(x * w1 + b1) -- outer-product broadcast, pure VPU.
    h = jnp.maximum(w1 * x + b1, 0.0)       # (H_PAD, N)

    # Layer 2: predict = sum_j w2[j] * h[j, :] + b2 -- elementwise mul (VPU),
    # cross-sublane reduce (XLU), scalar-splat add.  No MXU: both
    # contractions are degenerate (K=1 / out=1).
    y = jnp.sum(w2 * h, axis=0, keepdims=True) + b2_ref[0, 0]   # (1, N)
    o_ref[...] = y.astype(o_ref.dtype)


def pack_params(w1, b1, w2):
    """Pack weight columns once per weight update (hoisted out of the forward
    path): (H_PAD, 3) f32 with zero-padded rows below row H.

    w1: (1, H); b1: (1, H); w2: (H, 1)  (stored as (in, out), i.e. transposed
    vs. torch.nn.Linear's (out, in) storage)."""
    H = w1.shape[1]
    assert H <= H_PAD
    cols = jnp.stack([w1[0, :], b1[0, :], w2[:, 0]], axis=1)   # (H, 3)
    return jnp.pad(cols.astype(jnp.float32), ((0, H_PAD - H), (0, 0)))


@jax.jit
def net_forward(x, params, b2):
    """Pallas TPU forward for Net.

    x: (N, 1); params: (H_PAD, 3) from pack_params; b2: (1, 1)."""
    N, F = x.shape
    assert F == 1, "kernel specialized to the regression Net (F=O=1)"
    assert N <= N_MAX
    # TODO(synk): for N > N_MAX add a lane-axis grid with >= (1, 512) lane
    # blocks and dimension_semantics=("parallel",) so v7x's two TensorCores
    # split the batch; unnecessary at this size.

    x_lanes = x.reshape(1, N).astype(jnp.float32)   # batch along lanes

    out = pl.pallas_call(
        mlp_kernel,
        out_shape=jax.ShapeDtypeStruct((1, N), jnp.float32),
        in_specs=[
            pl.BlockSpec(memory_space=pltpu.MemorySpace.VMEM),   # x
            pl.BlockSpec(memory_space=pltpu.MemorySpace.VMEM),   # packed w1/b1/w2
            pl.BlockSpec(memory_space=pltpu.MemorySpace.SMEM),   # b2 scalar
        ],
        out_specs=pl.BlockSpec(memory_space=pltpu.MemorySpace.VMEM),
    )(x_lanes, params, b2.astype(jnp.float32))

    return out.reshape(N, 1).astype(x.dtype)


def init_params(key, n_feature, n_hidden, n_output, dtype=jnp.float32):
    """Deterministic init mimicking torch.nn.Linear's U(-1/sqrt(fan_in), ...)."""
    k1, k2, k3, k4 = jax.random.split(key, 4)
    bound1 = 1.0 / jnp.sqrt(jnp.array(n_feature, dtype))
    bound2 = 1.0 / jnp.sqrt(jnp.array(n_hidden, dtype))
    # stored as (in, out) so the math is x @ W
    w1 = jax.random.uniform(k1, (n_feature, n_hidden), dtype, -bound1, bound1)
    b1 = jax.random.uniform(k2, (1, n_hidden), dtype, -bound1, bound1)
    w2 = jax.random.uniform(k3, (n_hidden, n_output), dtype, -bound2, bound2)
    b2 = jax.random.uniform(k4, (1, n_output), dtype, -bound2, bound2)
    return w1, b1, w2, b2


if __name__ == "__main__":
    # Shapes from the regression example: x = linspace(-1, 1, 100)[:, None]
    # -> (100, 1); Net(nFeature=1, nHidden=10, nOutput=1).
    N, F, H, O = 100, 1, 10, 1

    key = jax.random.PRNGKey(0)
    kx, kp = jax.random.split(key)

    x = jnp.expand_dims(jnp.linspace(-1.0, 1.0, N, dtype=jnp.float32), axis=1)
    w1, b1, w2, b2 = init_params(kp, F, H, O)

    # Pack once (per weight update), then run the jitted forward.
    params = pack_params(w1, b1, w2)
    out = net_forward(x, params, b2)
    out = jax.block_until_ready(out)

    # Pure-JAX reference check of the full module forward.
    ref = jnp.maximum(x @ w1 + b1, 0.0) @ w2 + b2
    assert out.shape == (N, O)
    assert jnp.allclose(out, ref, atol=1e-5, rtol=1e-5)

    print("KERNEL_OK")
</pallas_src>

<mosaic_0001>
module attributes {stable_mosaic.version = 11 : i64} {
  func.func @mlp_kernel(%arg0: memref<1x100xf32, #tpu.memory_space<vmem>>, %arg1: memref<16x3xf32, #tpu.memory_space<vmem>>, %arg2: memref<1x1xf32, #tpu.memory_space<smem>>, %arg3: memref<1x100xf32, #tpu.memory_space<vmem>>) attributes {dimension_semantics = [], scalar_prefetch = 0 : i64, scratch_operands = 0 : i64, tpu.core_type = #tpu.core_type<tc>} {
    %c0 = arith.constant 0 : index
    %c0_0 = arith.constant 0 : index
    %0 = vector.load %arg0[%c0, %c0_0] : memref<1x100xf32, #tpu.memory_space<vmem>>, vector<1x100xf32>
    %c0_1 = arith.constant 0 : index
    %c0_2 = arith.constant 0 : index
    %1 = vector.load %arg1[%c0_1, %c0_2] : memref<16x3xf32, #tpu.memory_space<vmem>>, vector<16x1xf32>
    %c0_3 = arith.constant 0 : index
    %c1 = arith.constant 1 : index
    %2 = vector.load %arg1[%c0_3, %c1] : memref<16x3xf32, #tpu.memory_space<vmem>>, vector<16x1xf32>
    %c0_4 = arith.constant 0 : index
    %c2 = arith.constant 2 : index
    %3 = vector.load %arg1[%c0_4, %c2] : memref<16x3xf32, #tpu.memory_space<vmem>>, vector<16x1xf32>
    %4 = vector.broadcast %1 : vector<16x1xf32> to vector<16x100xf32>
    %5 = vector.broadcast %0 : vector<1x100xf32> to vector<16x100xf32>
    %6 = arith.mulf %4, %5 : vector<16x100xf32>
    %7 = vector.broadcast %2 : vector<16x1xf32> to vector<16x100xf32>
    %8 = arith.addf %6, %7 : vector<16x100xf32>
    %cst = arith.constant 0.000000e+00 : f32
    %9 = vector.broadcast %cst : f32 to vector<16x100xf32>
    %10 = arith.maximumf %8, %9 : vector<16x100xf32>
    %11 = vector.broadcast %3 : vector<16x1xf32> to vector<16x100xf32>
    %12 = arith.mulf %11, %10 : vector<16x100xf32>
    %cst_5 = arith.constant dense<0.000000e+00> : vector<100xf32>
    %13 = vector.multi_reduction <add>, %12, %cst_5 [0] : vector<16x100xf32> to vector<100xf32>
    %14 = vector.shape_cast %13 : vector<100xf32> to vector<1x100xf32>
    %c0_6 = arith.constant 0 : index
    %c0_7 = arith.constant 0 : index
    %15 = memref.load %arg2[%c0_6, %c0_7] : memref<1x1xf32, #tpu.memory_space<smem>>
    %16 = vector.broadcast %15 : f32 to vector<1x100xf32>
    %17 = arith.addf %14, %16 : vector<1x100xf32>
    %c0_8 = arith.constant 0 : index
    %c0_9 = arith.constant 0 : index
    %18 = vector.load %arg3[%c0_8, %c0_9] : memref<1x100xf32, #tpu.memory_space<vmem>>, vector<1x100xf32>
    tpu.vector_store %arg3[%c0_8, %c0_9], %17 {strides = array<i32>} : memref<1x100xf32, #tpu.memory_space<vmem>>, vector<1x100xf32>,
    return
  }
}

</mosaic_0001>

<bundles_post_ra>
// kernel: net_forward.1
= control target key start
LH: loop header
LB: loop body
LE: loop exit
PB: predicated region body
PF: predicated region fallthrough
CT: control target
= control target key end

     0   :  { %v122_v1 = vmov 1   ;;  %v123_v2 = vmov 0   ;;  %s161_s0 = inlined_call_operand.vmem [shape: f32[1,100], index: 0, kind: input, shape index: {}]   ;;  %s162_s1 = inlined_call_operand.vmem [shape: f32[16,3], index: 1, kind: input, shape index: {}]   ;;  %s163_s2 = inlined_call_operand.<no memory space> [shape: f32[1,1], index: 2, kind: input, shape index: {}]   ;;  %s164_s3 = inlined_call_operand.hbm [shape: f32[1,100], index: 3, kind: output, shape index: {}]  }
   0x1   :  { %v17_v0 = vld [vmem:[%s162_s1] sm:$0xff]  ;;  %92 = vset.pattern.permute.xlu1 %v122_v1  ;;  %91 = vset.pattern.permute.xlu0 %v123_v2 }
   0x2   :  { %9 = vsyncpa [#allocation4], 0  ;;  %35 = vperm.xlu1 %92, %v17_v0   ;;  %21 = vperm.xlu0 %91, %v17_v0   ;;  %v124_v3 = vmov 2   ;;  %v18_v4 = vld [vmem:[%s162_s1 + $0x8] sm:$0xff]  ;;  %v95_v5 = vld [vmem:[%s161_s0] ss:$0 sm:$0xff]  ;;  %v67_v28 = vstv %s163_s2 }
   0x3   :  { %93 = vset.pattern.permute.xlu2 %v124_v3  ;;  %vm56_vm0 = vcmask 818176   ;;  %s125_s18 = smov [#allocation3]   ;;  %s78_s22 = sshll.u32 %s164_s3, 4  ;;  %vm69_vm1 = vcmask 811008   ;;  %s79_s22 = int_to_ptr.hbm [resolvable:$true] %s78_s22 }
   0x4   :  { %47 = vperm.xlu2 %93, %v17_v0   ;;  %s76_s19 = sshll.u32 %s125_s18, 4  ;;  %s77_s19 = int_to_ptr.vmem [resolvable:$true] %s76_s19 }
   0xa   :  { %39 = vperm.xlu1 %92, %v18_v4   ;;  %26 = vperm.xlu0 %91, %v18_v4  }
   0xc   :  { %51 = vperm.xlu2 %93, %v18_v4  }
  0x12   :  { %94 = vset.pattern.permute.xlu0 %v124_v3 }
  0x5e   :  { %v48_v9 = vpop.permute.xlu2 %47 }
  0x66   :  { %v52_v18 = vpop.permute.xlu2 %51 }
  0x74   :  { %v36_v6 = vpop.permute.xlu1 %35  ;;  %v22_v7 = vpop.permute.xlu0 %21 }
  0x75   :  { %v32_v8 = vmul.f32 %v95_v5, %v22_v7 }
  0x77   :  { %v42_v10 = vadd.f32 %v36_v6, %v32_v8 }
  0x79   :  { %v44_v12 = vmax.f32 %v42_v10, 0.0 }
  0x7b   :  { %v54_v16 = vmul.f32 %v48_v9, %v44_v12 }
  0x7c   :  { %v27_v11 = vpop.permute.xlu0 %26  ;;  %v40_v14 = vpop.permute.xlu1 %39 }
  0x7d   :  { %v33_v13 = vmul.f32 %v95_v5, %v27_v11  ;;  %v57_v20 = vsel %vm56_vm0, %v54_v16, 0.0 }
  0x7f   :  { %v43_v15 = vadd.f32 %v40_v14, %v33_v13 }
  0x81   :  { %v45_v17 = vmax.f32 %v43_v15, 0.0 }
  0x83   :  { %v55_v19 = vmul.f32 %v52_v18, %v45_v17 }
  0x85   :  { %v58_v21 = vsel %vm56_vm0, %v55_v19, 0.0 }
  0x86   :  { %v59_v22 = vadd.f32 %v58_v21, %v57_v20 }
  0x88   :  { %v60_v23 = vrot.slane %v59_v22, 4 }
  0x8a   :  { %v61_v24 = vadd.f32 %v60_v23, %v59_v22 }
  0x8c   :  { %v62_v25 = vrot.slane %v61_v24, 2 }
  0x8e   :  { %v63_v26 = vadd.f32 %v62_v25, %v61_v24 }
  0x90   :  { %v64_v27 = vrot.slane %v63_v26, 1 }
  0x92   :  { %v65_v29 = vadd.f32 %v64_v27, %v63_v26 }
  0x94   :  { %v68_v30 = vadd.f32 %v67_v28, %v65_v29 }
  0x96   :  { %70 = vst.msk [vmem:[#allocation3] sm:$0x1] %vm69_vm1, %v68_v30 }
  0x97   :  { %81 = dma.vmem_to_hbm [thread:$0]  %s77_s19, 16, %s79_s22, [#allocation4]  }
  0x98   :  { %120 = dma.done.wait [#allocation4], 16  }
  0x99   :  { %121 = vsyncadd [#allocation4], 4294967280 }
  0x9a   :  { %86 = vsyncpa [#allocation4], 1 }

</bundles_post_ra>
